<compile_context>
chip_gen: v6e
topology: v6e:2x2x1
jax: 0.10.0
libtpu: 0.0.40
codegen_flags: <defaults>
</compile_context>

<pallas_src>
import functools
import math

import jax
import jax.numpy as jnp
from jax import lax
from jax.experimental import pallas as pl
from jax.experimental.pallas import tpu as pltpu

LAYER_NORM_EPS = 1e-6                         # Pix2Struct config.layer_norm_eps
_NEG_INF = float(jnp.finfo(jnp.float32).min)  # torch.finfo(float32).min


def _new_gelu(x):
    # "gelu_new" (tanh approximation) used by Pix2Struct's MLP.
    c = math.sqrt(2.0 / math.pi)
    return 0.5 * x * (1.0 + jnp.tanh(c * (x + 0.044715 * (x * x * x))))


def _vmem_limit_bytes():
    """Per-chip VMEM limit: ~3/4 of physical (96 MiB v5e/v6e, 48 MiB v7x)."""
    try:
        cap = int(pltpu.get_tpu_info().vmem_capacity_bytes)
    except Exception:
        cap = 64 * 1024 * 1024   # conservative fallback
    return min((cap * 3) // 4, 100 * 1024 * 1024)


def _cparams(n_grid, vmem_limit):
    return pltpu.CompilerParams(
        dimension_semantics=("parallel",) * n_grid,
        vmem_limit_bytes=vmem_limit,
    )


# --------------------------------------------------------------------------- kernels


def _rmsnorm_qkv_kernel(x_ref, g_ref, w_ref, qkv_ref):
    # x_ref: (1, ts, D); g_ref: (1, D); w_ref: (D, 3D) bf16 resident in VMEM.
    x = x_ref[0].astype(jnp.float32)
    var = jnp.mean(x * x, axis=-1, keepdims=True)                 # T5 RMSNorm: no mean subtraction
    xn = x * lax.rsqrt(var + LAYER_NORM_EPS) * g_ref[...].astype(jnp.float32)
    qkv = jnp.dot(xn.astype(jnp.bfloat16), w_ref[...],
                  preferred_element_type=jnp.float32)
    qkv_ref[0] = qkv.astype(qkv_ref.dtype)


def _attn_core(q, k, v, o_ref, bias, num_heads):
    # q: (tq, D) bf16, k/v: (S, D) bf16, bias: None or (1, S) f32 additive bias (masked_fill'ed).
    tq, D = q.shape
    d = D // num_heads
    outs = []
    for h in range(num_heads):                                    # static unroll, H is small
        qh = q[:, h * d:(h + 1) * d]
        kh = k[:, h * d:(h + 1) * d]
        vh = v[:, h * d:(h + 1) * d]
        # scores = q @ k^T  (Pix2Struct vision attention has no 1/sqrt(d) scaling)
        s = lax.dot_general(qh, kh, (((1,), (1,)), ((), ())),
                            preferred_element_type=jnp.float32)
        if bias is not None:
            s = s + bias
            s = jnp.maximum(s, _NEG_INF)                          # torch.max(scores, finfo.min)
        m = jnp.max(s, axis=-1, keepdims=True)
        p = jnp.exp(s - m)
        l = jnp.sum(p, axis=-1, keepdims=True)
        # normalize after the PV matmul: (p @ v) * 1/l  (EUP reciprocal, effectively free)
        o_h = jnp.dot(p.astype(v.dtype), vh, preferred_element_type=jnp.float32)
        outs.append(o_h * pl.reciprocal(l, approx=True))
        # TODO(synk): attention dropout / layer_head_mask omitted (eval mode, head_mask=None).
    o_ref[0] = jnp.concatenate(outs, axis=-1).astype(o_ref.dtype)


def _attn_nomask_kernel(q_ref, k_ref, v_ref, o_ref, *, num_heads):
    # mask is None -> additive bias is exactly zero; skip bias add and clamp.
    _attn_core(q_ref[0], k_ref[0], v_ref[0], o_ref, None, num_heads)


def _attn_mask_kernel(mask_ref, q_ref, k_ref, v_ref, o_ref, *, num_heads):
    # mask_ref: (1, 1, S). Build the additive bias in-kernel (no (B,H,S,S) HBM tensor).
    mask = mask_ref[0].astype(jnp.float32)                        # (1, S)
    bias = jnp.where(mask == 0.0, _NEG_INF, 1.0 - mask)
    _attn_core(q_ref[0], k_ref[0], v_ref[0], o_ref, bias, num_heads)


def _outproj_mlp_kernel(ctx_ref, res_ref, g_ref, wo_attn_ref, wi0_ref, wi1_ref,
                        wo_mlp_ref, o_ref):
    # Fused: attn out-projection + residual, pre-MLP RMSNorm, gated-GELU MLP, residual.
    # ctx_ref: (1, ts, D) bf16; res_ref: (1, ts, D); weights bf16, resident whole in VMEM.
    # TODO(synk): for very large hidden sizes (Pix2Struct-large on v7x) chunk the 4D ffn
    #             dimension instead of keeping wi0/wi1/wo_mlp whole in VMEM.
    ctx = ctx_ref[0]                                               # bf16
    attn_out = jnp.dot(ctx, wo_attn_ref[...], preferred_element_type=jnp.float32)
    hidden = attn_out + res_ref[0].astype(jnp.float32)             # attention residual add

    var = jnp.mean(hidden * hidden, axis=-1, keepdims=True)
    h = hidden * lax.rsqrt(var + LAYER_NORM_EPS) * g_ref[...].astype(jnp.float32)
    hb = h.astype(jnp.bfloat16)
    a = jnp.dot(hb, wi0_ref[...], preferred_element_type=jnp.float32)
    b = jnp.dot(hb, wi1_ref[...], preferred_element_type=jnp.float32)
    gate = (_new_gelu(a) * b).astype(jnp.bfloat16)
    # TODO(synk): MLP dropout omitted (eval mode).
    y = jnp.dot(gate, wo_mlp_ref[...], preferred_element_type=jnp.float32)
    o_ref[0] = (y + hidden).astype(o_ref.dtype)


# --------------------------------------------------------------------------- wrapper


def pix2struct_vision_layer(hidden_states, params, *, num_heads, attention_mask=None):
    """Forward pass of Pix2StructVisionLayer. Returns (layer_output, position_bias)."""
    B, S, D = hidden_states.shape
    assert D % num_heads == 0
    dtype = hidden_states.dtype

    if attention_mask is not None and attention_mask.ndim != 2:
        # TODO(synk): only None / (B, S) masks are lowered into the attention kernel.
        raise NotImplementedError("only 2-D attention masks are supported in-kernel")

    vmem_limit = _vmem_limit_bytes()
    big_vmem = vmem_limit >= 80 * 1024 * 1024
    max_rows = 512 if big_vmem else 256
    ts = S if S <= max_rows else max_rows          # row tile for K1 / K34
    tq = S if S <= max_rows else 256               # query tile for attention

    # bf16 weights, resident whole in VMEM inside the kernels (halves residency + DMA).
    w_qkv = jnp.concatenate([params["wq"], params["wk"], params["wv"]],
                            axis=1).astype(jnp.bfloat16)           # (D, 3D)
    wo_attn = params["wo_attn"].astype(jnp.bfloat16)               # (D, D)
    wi0 = params["wi0"].astype(jnp.bfloat16)                       # (D, 4D)
    wi1 = params["wi1"].astype(jnp.bfloat16)                       # (D, 4D)
    wo_mlp = params["wo_mlp"].astype(jnp.bfloat16)                 # (4D, D)
    ln_attn = params["ln_attn"].reshape(1, D)
    ln_mlp = params["ln_mlp"].reshape(1, D)

    vmem_whole = pl.BlockSpec(memory_space=pltpu.MemorySpace.VMEM)
    n_s = pl.cdiv(S, ts)
    n_q = pl.cdiv(S, tq)

    # --- K1: fused pre-attention RMSNorm + concatenated Q/K/V projection -> (B, S, 3D) bf16 ---
    qkv = pl.pallas_call(
        _rmsnorm_qkv_kernel,
        out_shape=jax.ShapeDtypeStruct((B, S, 3 * D), jnp.bfloat16),
        grid=(B, n_s),
        in_specs=[pl.BlockSpec((1, ts, D), lambda b, si: (b, si, 0)),
                  vmem_whole, vmem_whole],
        out_specs=pl.BlockSpec((1, ts, 3 * D), lambda b, si: (b, si, 0)),
        compiler_params=_cparams(2, vmem_limit),
    )(hidden_states, ln_attn, w_qkv)

    # --- K2: attention. Q/K/V blocks are column slices of the same (B, S, 3D) tensor
    #         (no host-side head split/merge transposes); heads handled inside the kernel. ---
    q_spec = pl.BlockSpec((1, tq, D), lambda b, qi: (b, qi, 0))
    k_spec = pl.BlockSpec((1, S, D), lambda b, qi: (b, 0, 1))
    v_spec = pl.BlockSpec((1, S, D), lambda b, qi: (b, 0, 2))
    ctx_spec = pl.BlockSpec((1, tq, D), lambda b, qi: (b, qi, 0))
    # TODO(synk): for very long sequences also tile K/V (flash-style online softmax).

    if attention_mask is None:
        ctx = pl.pallas_call(
            functools.partial(_attn_nomask_kernel, num_heads=num_heads),
            out_shape=jax.ShapeDtypeStruct((B, S, D), jnp.bfloat16),
            grid=(B, n_q),
            in_specs=[q_spec, k_spec, v_spec],
            out_specs=ctx_spec,
            compiler_params=_cparams(2, vmem_limit),
        )(qkv, qkv, qkv)
    else:
        mask3 = attention_mask.astype(jnp.float32).reshape(B, 1, S)
        mask_spec = pl.BlockSpec((1, 1, S), lambda b, qi: (b, 0, 0))
        ctx = pl.pallas_call(
            functools.partial(_attn_mask_kernel, num_heads=num_heads),
            out_shape=jax.ShapeDtypeStruct((B, S, D), jnp.bfloat16),
            grid=(B, n_q),
            in_specs=[mask_spec, q_spec, k_spec, v_spec],
            out_specs=ctx_spec,
            compiler_params=_cparams(2, vmem_limit),
        )(mask3, qkv, qkv, qkv)

    # --- K3+K4 fused: out-projection + residual + pre-MLP RMSNorm + gated-GELU MLP + residual ---
    layer_out = pl.pallas_call(
        _outproj_mlp_kernel,
        out_shape=jax.ShapeDtypeStruct((B, S, D), dtype),
        grid=(B, n_s),
        in_specs=[pl.BlockSpec((1, ts, D), lambda b, si: (b, si, 0)),   # ctx
                  pl.BlockSpec((1, ts, D), lambda b, si: (b, si, 0)),   # residual (original x)
                  vmem_whole, vmem_whole, vmem_whole, vmem_whole, vmem_whole],
        out_specs=pl.BlockSpec((1, ts, D), lambda b, si: (b, si, 0)),
        compiler_params=_cparams(2, vmem_limit),
    )(ctx, hidden_states, ln_mlp, wo_attn, wi0, wi1, wo_mlp)

    # --- position_bias return value (spec: 1 - (zeros + mask), *before* masked_fill).
    #     Only built as an output; the attention kernel never reads this dense tensor. ---
    if attention_mask is None:
        mask2 = jnp.ones((B, S), dtype)
    else:
        mask2 = attention_mask.astype(dtype)
    position_bias = jnp.zeros((1, num_heads, S, S), dtype) + mask2[:, None, None, :]
    position_bias = 1.0 - position_bias

    return layer_out, position_bias


# --------------------------------------------------------------------------- reference


def _reference(x, params, num_heads, attention_mask=None):
    """Pure-jnp f32 reference mirroring the PyTorch module."""
    B, S, D = x.shape
    d = D // num_heads

    def rmsnorm(h, w):
        var = jnp.mean(h.astype(jnp.float32) ** 2, axis=-1, keepdims=True)
        return w * (h * lax.rsqrt(var + LAYER_NORM_EPS))

    residual = x
    h = rmsnorm(x, params["ln_attn"])
    q = h @ params["wq"]
    k = h @ params["wk"]
    v = h @ params["wv"]

    def heads(t):
        return t.reshape(B, S, num_heads, d).transpose(0, 2, 1, 3)

    qh, kh, vh = heads(q), heads(k), heads(v)
    scores = jnp.einsum("bhqd,bhkd->bhqk", qh, kh)

    if attention_mask is None:
        attention_mask = jnp.ones((B, S), x.dtype)
    position_bias = (jnp.zeros((1, num_heads, S, S), x.dtype)
                     + attention_mask.astype(x.dtype)[:, None, None, :])
    position_bias = 1.0 - position_bias
    bias_masked = jnp.where(position_bias == 1.0, _NEG_INF, position_bias)

    scores = scores + bias_masked
    scores = jnp.maximum(scores, _NEG_INF)
    w = jax.nn.softmax(scores.astype(jnp.float32), axis=-1).astype(scores.dtype)
    ctx = jnp.einsum("bhqk,bhkd->bhqd", w, vh).transpose(0, 2, 1, 3).reshape(B, S, D)
    attn_out = ctx @ params["wo_attn"]
    hidden = attn_out + residual
    h2 = rmsnorm(hidden, params["ln_mlp"])
    g = _new_gelu(h2 @ params["wi0"]) * (h2 @ params["wi1"])
    out = g @ params["wo_mlp"] + hidden
    return out, position_bias


# --------------------------------------------------------------------------- main


if __name__ == "__main__":
    batch, seq, hidden_size, num_heads = 2, 8, 128, 4
    mlp_dim = 4 * hidden_size

    key = jax.random.PRNGKey(0)
    keys = jax.random.split(key, 9)
    scale = 0.05
    x = jax.random.normal(keys[0], (batch, seq, hidden_size), dtype=jnp.float32)

    # Weights are stored as (in, out) "kernel" matrices; equivalent to nn.Linear(bias=False)
    # with weight = kernel.T. LayerNorm weights initialized near 1 (module init is ones).
    params = {
        "ln_attn": 1.0 + 0.1 * jax.random.normal(keys[1], (hidden_size,), jnp.float32),
        "ln_mlp": 1.0 + 0.1 * jax.random.normal(keys[2], (hidden_size,), jnp.float32),
        "wq": scale * jax.random.normal(keys[3], (hidden_size, hidden_size), jnp.float32),
        "wk": scale * jax.random.normal(keys[4], (hidden_size, hidden_size), jnp.float32),
        "wv": scale * jax.random.normal(keys[5], (hidden_size, hidden_size), jnp.float32),
        "wo_attn": scale * jax.random.normal(keys[6], (hidden_size, hidden_size), jnp.float32),
        "wi0": scale * jax.random.normal(keys[7], (hidden_size, mlp_dim), jnp.float32),
        "wi1": scale * jax.random.normal(keys[8], (hidden_size, mlp_dim), jnp.float32),
        "wo_mlp": scale * jax.random.normal(keys[0], (mlp_dim, hidden_size), jnp.float32),
    }

    # Matmul operands are cast to bf16 for the MXU (f32 accumulation), so the tolerance
    # vs the pure-f32 reference is wider than the f32-only version.
    ATOL = RTOL = 5e-2

    # --- case 1: attention_mask=None (the default module path) ---
    y, bias = pix2struct_vision_layer(x, params, num_heads=num_heads)
    jax.block_until_ready(y)
    y_ref, bias_ref = _reference(x, params, num_heads)
    assert jnp.allclose(y, y_ref, atol=ATOL, rtol=RTOL), (
        "layer output mismatch (no mask), max abs diff = %e"
        % float(jnp.max(jnp.abs(y - y_ref))))
    assert jnp.allclose(bias, bias_ref), "position_bias mismatch (no mask)"

    # --- case 2: 2-D attention mask ---
    mask = jnp.ones((batch, seq), jnp.float32).at[1, -3:].set(0.0)
    y2, bias2 = pix2struct_vision_layer(x, params, num_heads=num_heads,
                                        attention_mask=mask)
    jax.block_until_ready(y2)
    y2_ref, bias2_ref = _reference(x, params, num_heads, attention_mask=mask)
    assert jnp.allclose(y2, y2_ref, atol=ATOL, rtol=RTOL), (
        "layer output mismatch (masked), max abs diff = %e"
        % float(jnp.max(jnp.abs(y2 - y2_ref))))
    assert jnp.allclose(bias2, bias2_ref), "position_bias mismatch (masked)"

    print("KERNEL_OK")
</pallas_src>

<mosaic_0001>
module attributes {stable_mosaic.version = 11 : i64} {
  func.func @_rmsnorm_qkv_kernel(%arg0: i32, %arg1: i32, %arg2: memref<1x8x128xf32, #tpu.memory_space<vmem>>, %arg3: memref<1x128xf32, #tpu.memory_space<vmem>>, %arg4: memref<128x384xbf16, #tpu.memory_space<vmem>>, %arg5: memref<1x8x384xbf16, #tpu.memory_space<vmem>>) attributes {dimension_semantics = [#tpu.dimension_semantics<parallel>, #tpu.dimension_semantics<parallel>], iteration_bounds = array<i64: 2, 1>, scalar_prefetch = 0 : i64, scratch_operands = 0 : i64, tpu.core_type = #tpu.core_type<tc>, window_params = [{transform_indices = @transform_0, window_bounds = array<i64: 1, 8, 128>}, {pipeline_mode = #tpu.pipeline_mode<synchronous>, transform_indices = @transform_1, window_bounds = array<i64: 1, 128>}, {pipeline_mode = #tpu.pipeline_mode<synchronous>, transform_indices = @transform_2, window_bounds = array<i64: 128, 384>}, {transform_indices = @transform_3, window_bounds = array<i64: 1, 8, 384>}]} {
    %c0 = arith.constant 0 : index
    %c0_0 = arith.constant 0 : index
    %c0_1 = arith.constant 0 : index
    %0 = vector.load %arg2[%c0, %c0_0, %c0_1] : memref<1x8x128xf32, #tpu.memory_space<vmem>>, vector<1x8x128xf32>
    %1 = vector.shape_cast %0 : vector<1x8x128xf32> to vector<8x128xf32>
    %2 = arith.mulf %1, %1 : vector<8x128xf32>
    %cst = arith.constant dense<0.000000e+00> : vector<8xf32>
    %3 = vector.multi_reduction <add>, %2, %cst [1] : vector<8x128xf32> to vector<8xf32>
    %4 = vector.shape_cast %3 : vector<8xf32> to vector<8x1xf32>
    %cst_2 = arith.constant 1.280000e+02 : f32
    %5 = vector.broadcast %cst_2 : f32 to vector<8x1xf32>
    %6 = arith.divf %4, %5 : vector<8x1xf32>
    %cst_3 = arith.constant 9.99999997E-7 : f32
    %7 = vector.broadcast %cst_3 : f32 to vector<8x1xf32>
    %8 = arith.addf %6, %7 : vector<8x1xf32>
    %9 = math.rsqrt %8 : vector<8x1xf32>
    %10 = vector.broadcast %9 : vector<8x1xf32> to vector<8x128xf32>
    %11 = arith.mulf %1, %10 : vector<8x128xf32>
    %c0_4 = arith.constant 0 : index
    %c0_5 = arith.constant 0 : index
    %12 = vector.load %arg3[%c0_4, %c0_5] : memref<1x128xf32, #tpu.memory_space<vmem>>, vector<1x128xf32>
    %13 = vector.broadcast %12 : vector<1x128xf32> to vector<8x128xf32>
    %14 = arith.mulf %11, %13 : vector<8x128xf32>
    %15 = arith.truncf %14 : vector<8x128xf32> to vector<8x128xbf16>
    %c0_6 = arith.constant 0 : index
    %c0_7 = arith.constant 0 : index
    %16 = vector.load %arg4[%c0_6, %c0_7] : memref<128x384xbf16, #tpu.memory_space<vmem>>, vector<128x384xbf16>
    %cst_8 = arith.constant dense<0.000000e+00> : vector<8x384xf32>
    %17 = tpu.matmul %15, %16, %cst_8 {dimension_numbers = #tpu.dot_dimension_numbers<[1], [0], [0], [1], [0, 0, 1, 1], [], []>} : vector<8x128xbf16>, vector<128x384xbf16>, vector<8x384xf32> -> vector<8x384xf32>
    %18 = arith.truncf %17 : vector<8x384xf32> to vector<8x384xbf16>
    %c0_9 = arith.constant 0 : index
    %c0_10 = arith.constant 0 : index
    %c0_11 = arith.constant 0 : index
    %19 = vector.load %arg5[%c0_9, %c0_10, %c0_11] : memref<1x8x384xbf16, #tpu.memory_space<vmem>>, vector<1x8x384xbf16>
    %20 = vector.shape_cast %19 : vector<1x8x384xbf16> to vector<8x384xbf16>
    %21 = vector.shape_cast %18 : vector<8x384xbf16> to vector<1x8x384xbf16>
    tpu.vector_store %arg5[%c0_9, %c0_10, %c0_11], %21 {strides = array<i32>} : memref<1x8x384xbf16, #tpu.memory_space<vmem>>, vector<1x8x384xbf16>,
    return
  }
  func.func @transform_0(%arg0: i32, %arg1: i32) -> (i32, i32, i32) {
    %c0_i32 = arith.constant 0 : i32
    %c0_i32_0 = arith.constant 0 : i32
    return %arg0, %arg1, %c0_i32 : i32, i32, i32
  }
  func.func @transform_1(%arg0: i32, %arg1: i32) -> (i32, i32) {
    %c0_i32 = arith.constant 0 : i32
    %c0_i32_0 = arith.constant 0 : i32
    %c0_i32_1 = arith.constant 0 : i32
    return %c0_i32, %c0_i32_0 : i32, i32
  }
  func.func @transform_2(%arg0: i32, %arg1: i32) -> (i32, i32) {
    %c0_i32 = arith.constant 0 : i32
    %c0_i32_0 = arith.constant 0 : i32
    %c0_i32_1 = arith.constant 0 : i32
    return %c0_i32, %c0_i32_0 : i32, i32
  }
  func.func @transform_3(%arg0: i32, %arg1: i32) -> (i32, i32, i32) {
    %c0_i32 = arith.constant 0 : i32
    %c0_i32_0 = arith.constant 0 : i32
    return %arg0, %arg1, %c0_i32 : i32, i32, i32
  }
}

</mosaic_0001>

<bundles_post_ra>
// kernel: tpu_custom_call.1
= control target key start
LH: loop header
LB: loop body
LE: loop exit
PB: predicated region body
PF: predicated region fallthrough
CT: control target
= control target key end

     0   :  { %8 = vsyncpa [#allocation3], 0  ;;  %s1143_s0 = inlined_call_operand.hbm [shape: f32[2,8,128], index: 0, kind: input, shape index: {}]   ;;  %s1144_s1 = inlined_call_operand.vmem [shape: f32[1,128], index: 1, kind: input, shape index: {}]   ;;  %s1145_s2 = inlined_call_operand.hbm [shape: bf16[128,384], index: 2, kind: input, shape index: {}]   ;;  %s1146_s3 = inlined_call_operand.hbm [shape: bf16[2,8,384], index: 3, kind: output, shape index: {}]  }
   0x1   :  { %10 = vsyncpa [#allocation3 + $0x1], 0 }
   0x2   :  { %11 = vsyncpa [#allocation6], 0 }
   0x3   :  { %12 = vsyncpa [#allocation4], 0 }
   0x4   :  { %14 = vsyncpa [#allocation4 + $0x1], 0  ;;  %s955_s12 = smov 0   ;;  %s957_s13 = smov 0  }
   0x5   :  { %s959_s14 = smov 0   ;;  %s961_s15 = smov 0  }
   0x6   :  { %s963_s16 = smov 0   ;;  %s965_s17 = smov 0  }
   0x7 LB: > { %s602_s18 = sadd.s32 4294967295, %s925_s17   ;;  %s603_s19 = sadd.s32 4294967294, %s925_s17   ;;  %s925_s17 = sphi %s965_s17, %s20_s17   ;;  %s921_s16 = sphi %s963_s16, %s1164_s16   ;;  %s917_s15 = sphi %s961_s15, %s1163_s15   ;;  %s913_s14 = sphi %s959_s14, %s1162_s14   ;;  %s909_s13 = sphi %s957_s13, %s1161_s13   ;;  %s905_s12 = sphi %s955_s12, %s1160_s12  }
   0x8   : > { %p54_p0 = scmp.ne.s32.totalorder %s909_s13, %s905_s12  ;;  %p989_p1 = scmp.eq.s32.totalorder %s602_s18, 0 }
   0x9   : > { %p993_p2 = scmp.eq.s32.totalorder %s602_s18, 1  ;;  %p128_p3 = scmp.eq.s32.totalorder %s603_s19, 1 }
   0xa   : > { %p999_p4 = por %p989_p1, %p54_p0  ;;  %p604_p5 = scmp.ge.s32.totalorder %s925_s17, 1 }
   0xb   : > { %p1004_p6 = por %p128_p3, %p54_p0  ;;  %p135_p7 = scmp.lt.s32.totalorder %s925_s17, 3 }
   0xc   : > { %s1150_s22 = scalar_select %p999_p4, 1, 0 }
   0xd   : > { %s1151_s23 = scalar_select %p1004_p6, 1, 0 }
   0xe   : > { %p1009_p8 = pnand %p604_p5, %p135_p7  ;;  %s927_s25 = smov [#allocation5]  }
   0xf   : > { %s150_s26 = sshll.u32 %s927_s25, 4  ;;  %s32_s28 = sadd.s32 1, %s921_s16  ;;  %s151_s26 = int_to_ptr.vmem [resolvable:$true] %s150_s26 }
  0x10   : > { %p683_p9 = pneg %p1009_p8  ;;  %s798_s29 = scalar_lea.vmem %s151_s26, 3072 }
  0x11   : > { %p799_p13 = scmp.ne.s32.totalorder %s151_s26, %s798_s29  ;;  %p806_p5 = scmp.lt.s32.totalorder %s151_s26, %s151_s26 }
  0x12   : > { %p1018_p11 = pnand %p683_p9, %p989_p1  ;;  %p807_p7 = scmp.lt.s32.totalorder %s798_s29, %s798_s29 }
  0x14   : > { %p789_p12 = pneg %p1018_p11  ;;  %p808_p6 = por %p807_p7, %p806_p5 }
  0x16   : > { %p801_p0 = pnand %p799_p13, %p789_p12 }
  0x18   : > { %p802_p3 = pneg %p801_p0 }
  0x1a   : > { %p809_p4 = pnand %p808_p6, %p802_p3 }
  0x1c   : > { %812 = shalt.err (!%p809_p4)
}
  0x1d   : > { %s928_s30 = smov 192   ;;  %s929_s4 = smov 12  }
  0x1e   : > { %686 = dma.hbm_to_vmem [thread:$0]  (!%p1018_p11), %s1145_s2, 3072, %s151_s26, [#allocation6], %s928_s30, %s928_s30, %s929_s4  }
  0x1f   : > { %p34_p6 = scmp.ge.s32.totalorder %s32_s28, 2  ;;  %s41_s7 = sadd.s32 1, %s913_s14 }
  0x20   : > { %p48_p4 = scmp.ne.s32.totalorder %s913_s14, %s909_s13  ;;  %p49_p9 = scmp.eq.s32.totalorder %s925_s17, 0 }
  0x21   : > { %s1166_s28 = smov (%p34_p6, %s32_s28), 0  ;;  %p696_p0 = scmp.lt.s32.totalorder %s925_s17, 2 }
  0x22   : > { %p1036_p12 = por %p49_p9, %p48_p4  ;;  %p1042_p13 = por %p993_p2, %p48_p4 }
  0x23   : > { %s36_s10 = ssub.s32 %s921_s16, %s1166_s28  ;;  %s164_s11 = sand.u32 1, %s913_s14  }
  0x24   : > { %p39_p11 = scmp.eq.s32.totalorder %s36_s10, 0  ;;  %s607_s18 = sshll.u32 %s164_s11, 3 }
  0x25   : > { %s608_s25 = sshll.u32 %s921_s16, 7  ;;  %s168_s30 = scalar_lea.vmem [#allocation2], %s607_s18 }
  0x26   : > { %s1051_s19 = scalar_select %p39_p11, %s913_s14, %s41_s7  }
  0x27   : > { %s174_s29 = scalar_lea.hbm %s1143_s0, %s608_s25  ;;  %s176_s4 = sshll.u32 %s168_s30, 4  ;;  %s177_s4 = int_to_ptr.vmem [resolvable:$true] %s176_s4 }
  0x28   : > { %p1059_p2 = pnand %p696_p0, %p1036_p12  ;;  %s165_s5 = scalar_lea.sflag [#allocation3], %s164_s11 }
  0x29   : > { %s826_s6 = scalar_lea.vmem %s177_s4, 128  ;;  %s930_s7 = smov [#allocation2]  }
  0x2a   : > { %p815_p3 = pneg %p1059_p2  ;;  %p827_p5 = scmp.ne.s32.totalorder %s177_s4, %s826_s6 }
  0x2b   : > { %s831_s10 = sshll.u32 %s930_s7, 4  ;;  %s832_s10 = int_to_ptr.vmem [resolvable:$false] %s831_s10 }
  0x2c   : > { %p829_p7 = pnand %p827_p5, %p815_p3  ;;  %s833_s25 = scalar_lea.vmem %s832_s10, 256 }
  0x2d   : > { %p834_p4 = scmp.lt.s32.totalorder %s177_s4, %s832_s10  ;;  %p835_p9 = scmp.lt.s32.totalorder %s833_s25, %s826_s6 }
  0x2e   : > { %p830_p6 = pneg %p829_p7 }
  0x2f   : > { %p836_p11 = por %p835_p9, %p834_p4 }
  0x31   : > { %p837_p10 = pnand %p836_p11, %p830_p6 }
  0x33   : > { %840 = shalt.err (!%p837_p10)
}
  0x34   : > { %690 = dma.hbm_to_vmem [thread:$0]  (!%p1059_p2), %s174_s29, 128, %s177_s4, %s165_s5  }
  0x35   : > { %185 = sbr.rel (%p1009_p8) target bundleno = 437 (0x1b5), region = 32  ;;  %s1070_s8 = sand.u32 (!%p1009_p8), 1, %s909_s13  }
  0x36   : > { %s610_s11 = sshll.u32 (!%p1009_p8), %s1070_s8, 3  ;;  %s188_s18 = scalar_lea.sflag (!%p1009_p8), [#allocation3], %s1070_s8 }
  0x37   : > { %s191_s26 = scalar_lea.vmem (!%p1009_p8), [#allocation2], %s610_s11  ;;  %p1157_p12 = scmp.ne.s32.totalorder (!%p1009_p8), %s1150_s22, 0 }
  0x3a   : > { %892 = dma.done.wait (%p1157_p12), %s188_s18, 128  }
  0x3b   : > { %894 = vsyncadd (%p1157_p12), %s188_s18, 4294967168 }
  0x3c   : > { %896 = dma.done.wait (%p989_p1), [#allocation6], 3072  }
  0x3d   : > { %898 = vsyncadd (%p989_p1), [#allocation6], 4294964224  ;;  %v931_v0 = vmov 0.0   ;;  %v1082_v1 = vld [vmem:[%s191_s26] sm:$0xff]  ;;  %v764_v11 = vld [vmem:[#allocation5 + $0x80] ss:$12 sps:$4 sm:$0xff]  }
  0x3e   : > { %653 = vmatprep.subr.bf16.mxu1 %v931_v0  ;;  %v220_v2 = vmul.f32 %v1082_v1, %v1082_v1  ;;  %v753_v3 = vld [vmem:[#allocation5 + $0xac] ss:$12 sps:$4 sm:$0xff]   ;;  %v755_v4 = vld [vmem:[#allocation5 + $0xa8] ss:$12 sps:$4 sm:$0xff]   ;;  %v756_v5 = vld [vmem:[#allocation5 + $0xb0] ss:$12 sps:$4 sm:$0xff]  }
  0x3f   : > { %397 = vmatprep.subr.bf16.mxu0 %v753_v3  ;;  %v757_v6 = vld [vmem:[#allocation5 + $0x94] ss:$12 sps:$4 sm:$0xff]   ;;  %v759_v7 = vld [vmem:[#allocation5 + $0x90] ss:$12 sps:$4 sm:$0xff]   ;;  %654 = vmatpush3.bf16.msra.mxu1 %v756_v5  ;;  %v760_v8 = vld [vmem:[#allocation5 + $0x98] ss:$12 sps:$4 sm:$0xff]  }
  0x40   : > { %221 = vadd.xlane.f32.xlu0 %v220_v2  ;;  %398 = vmatpush1.bf16.msra.mxu0 %v755_v4  ;;  %v761_v9 = vld [vmem:[#allocation5 + $0x7c] ss:$12 sps:$4 sm:$0xff]   ;;  %v763_v10 = vld [vmem:[#allocation5 + $0x78] ss:$12 sps:$4 sm:$0xff]   ;;  %v767_v13 = vld [vmem:[#allocation5 + $0x60] ss:$12 sps:$4 sm:$0xff]  }
  0x41   : > { %399 = vmatprep.subr.bf16.mxu0 %v757_v6  ;;  %655 = vmatprep.subr.bf16.mxu1 %v931_v0  ;;  %v765_v12 = vld [vmem:[#allocation5 + $0x64] ss:$12 sps:$4 sm:$0xff]   ;;  %v768_v14 = vld [vmem:[#allocation5 + $0x68] ss:$12 sps:$4 sm:$0xff]   ;;  %v769_v15 = vld [vmem:[#allocation5 + $0x4c] ss:$12 sps:$4 sm:$0xff]  }
  0x42   : > { %v771_v16 = vld [vmem:[#allocation5 + $0x48] ss:$12 sps:$4 sm:$0xff]   ;;  %v772_v17 = vld [vmem:[#allocation5 + $0x50] ss:$12 sps:$4 sm:$0xff]   ;;  %v776_v20 = vld [vmem:[#allocation5 + $0x38] ss:$12 sps:$4 sm:$0xff]  }
  0x43   : > { %656 = vmatpush3.bf16.msra.mxu1 %v760_v8  ;;  %v773_v18 = vld [vmem:[#allocation5 + $0x34] ss:$12 sps:$4 sm:$0xff]   ;;  %v775_v19 = vld [vmem:[#allocation5 + $0x30] ss:$12 sps:$4 sm:$0xff]   ;;  %v932_v22 = vmov 0   ;;  %vm933_vm0 = vmmov 0  }
  0x44   : > { %400 = vmatpush1.bf16.msra.mxu0 %v759_v7  ;;  %657 = vmatprep.subr.bf16.mxu1 %v931_v0  ;;  %v777_v21 = vld [vmem:[#allocation5 + $0x1c] ss:$12 sps:$4 sm:$0xff]   ;;  %v779_v23 = vld [vmem:[#allocation5 + $0x18] ss:$12 sps:$4 sm:$0xff]   ;;  %v780_v24 = vld [vmem:[#allocation5 + $0x20] ss:$12 sps:$4 sm:$0xff]  }
  0x45   : > { %401 = vmatprep.subr.bf16.mxu0 %v761_v9  ;;  %429 = vmatprep.mubr.bf16.mxu0 %v932_v22  ;;  %v781_v25 = vld [vmem:[#allocation5 + $0x4] ss:$12 sps:$4 sm:$0xff]   ;;  %v783_v26 = vld [vmem:[#allocation5] ss:$12 sps:$4 sm:$0xff]   ;;  %v784_v27 = vld [vmem:[#allocation5 + $0x8] ss:$12 sps:$4 sm:$0xff]  }
  0x46   : > { %669 = vmatprep.mubr.msk.bf16.mxu1 %vm933_vm0, %v931_v0  ;;  %v612_v32 = vld [vmem:[%s1144_s1] ss:$0 sm:$0xff]  ;;  %s673_s24 = smul.u32 12, %s1070_s8  ;;  %s934_s7 = smov [#allocation7]  }
  0x47   : > { %658 = vmatpush3.bf16.msra.mxu1 %v764_v11  ;;  %s674_s27 = smul.u32 192, %s917_s15  ;;  %s494_s15 = scalar_lea.sflag [#allocation4], %s1070_s8 }
  0x48   : > { %402 = vmatpush1.bf16.msra.mxu0 %v763_v10  ;;  %659 = vmatprep.subr.bf16.mxu1 %v931_v0  ;;  %s217_s29 = scalar_lea.vmem [#allocation7], %s673_s24  ;;  %s845_s10 = sshll.u32 %s934_s7, 4  ;;  %s846_s10 = int_to_ptr.vmem [resolvable:$false] %s845_s10 }
  0x49   : > { %403 = vmatprep.subr.bf16.mxu0 %v765_v12  ;;  %s510_s30 = sshll.u32 %s217_s29, 4  ;;  %s1095_s5 = scalar_lea.hbm %s1146_s3, %s674_s27  ;;  %s1097_s30 = int_to_ptr.vmem [resolvable:$true] %s510_s30 }
  0x4a   : > { %s841_s6 = scalar_lea.vmem %s1097_s30, 192  ;;  %s847_s25 = scalar_lea.vmem %s846_s10, 384 }
  0x4b   : > { %660 = vmatpush3.bf16.msra.mxu1 %v768_v14  ;;  %p842_p1 = scmp.ne.s32.totalorder %s1097_s30, %s841_s6  ;;  %p848_p0 = scmp.lt.s32.totalorder %s1097_s30, %s846_s10 }
  0x4c   : > { %404 = vmatpush1.bf16.msra.mxu0 %v767_v13  ;;  %661 = vmatprep.subr.bf16.mxu1 %v931_v0  ;;  %p849_p2 = scmp.lt.s32.totalorder %s847_s25, %s841_s6 }
  0x4d   : > { %405 = vmatprep.subr.bf16.mxu0 %v769_v15  ;;  %p843_p8 = pnand %p842_p1, %p1042_p13 }
  0x4e   : > { %p850_p3 = por %p849_p2, %p848_p0 }
  0x4f   : > { %662 = vmatpush3.bf16.msra.mxu1 %v772_v17  ;;  %p844_p10 = pneg %p843_p8 }
  0x50   : > { %406 = vmatpush1.bf16.msra.mxu0 %v771_v16  ;;  %663 = vmatprep.subr.bf16.mxu1 %v931_v0 }
  0x51   : > { %407 = vmatprep.subr.bf16.mxu0 %v773_v18  ;;  %p851_p5 = pnand %p850_p3, %p844_p10 }
  0x53   : > { %664 = vmatpush3.bf16.msra.mxu1 %v776_v20 }
  0x54   : > { %408 = vmatpush1.bf16.msra.mxu0 %v775_v19  ;;  %665 = vmatprep.subr.bf16.mxu1 %v931_v0 }
  0x55   : > { %409 = vmatprep.subr.bf16.mxu0 %v777_v21 }
  0x57   : > { %666 = vmatpush3.bf16.msra.mxu1 %v780_v24 }
  0x58   : > { %410 = vmatpush1.bf16.msra.mxu0 %v779_v23  ;;  %667 = vmatprep.subr.bf16.mxu1 %v931_v0 }
  0x59   : > { %411 = vmatprep.subr.bf16.mxu0 %v781_v25 }
  0x5b   : > { %668 = vmatpush3.bf16.msra.mxu1 %v784_v27 }
  0x5c   : > { %412 = vmatpush1.bf16.msra.mxu0 %v783_v26 }
  0xc9   : > { %v222_v28 = vpop.xlane.xlu0 %221 }
  0xca   : > { %v224_v29 = vmul.f32 0.0078125, %v222_v28 }
  0xcc   : > { %v225_v30 = vadd.f32 1e-06, %v224_v29 }
  0xce   : > { %785 = vrsqrt.f32 %v225_v30 }
  0xdb   : > { %v786_v31 = vpop.eup %785 }
  0xdc   : > { %v227_v33 = vmul.f32 %v786_v31, %v1082_v1 }
  0xde   : > { %v235_v34 = vmul.f32 %v612_v32, %v227_v33 }
  0xe0   : > { %v236_v35 = vpack.c.bf16 %v235_v34, %v235_v34 }
  0xe2   : > { %430 = vmatmul.mubr.bf16.vlgmr.msra.gmra.mxu0 %v236_v35  ;;  %670 = vmatmul.mubr.bf16.vlgmr.msra.gmra.mxu1 %v236_v35 }
 0x1a2   : > { %v431_v36 = vpop.f32.mrf.mxu0  ;;  %v472_v37 = vpop.f32.mrf.mxu1 }
 0x1a3   : > { %v643_v38 = vpack.c.bf16 %v472_v37, %v472_v37 }
 0x1a4   : > { %v433_v39 = vpop.f32.mrf.mxu0  ;;  %v671_v40 = vpop.f32.mrf.mxu1 }
 0x1a5   : > { %492 = vst [vmem:[%s217_s29 + $0x8] sm:$0xf] %v643_v38  ;;  %v642_v41 = vpack.c.bf16 %v433_v39, %v431_v36 }
 0x1a6   : > { %v435_v42 = vpop.f32.mrf.mxu0  ;;  %v475_v43 = vpop.f32.mrf.mxu1 }
 0x1a7   : > { %491 = vst [vmem:[%s217_s29] sm:$0xff] %v642_v41 }
 0x1a8   : > { %v436_v44 = vpop.f32.mrf.mxu0  ;;  %v672_v45 = vpop.f32.mrf.mxu1 }
 0x1a9   : > { %854 = shalt.err (!%p851_p5)
}
 0x1aa   : > { %s855_s11 = scalar_lea.hbm %s1095_s5, 192  ;;  %s859_s26 = scalar_lea.hbm %s1146_s3, 384 }
 0x1ab   : > { %p856_p7 = scmp.ne.s32.totalorder %s1095_s5, %s855_s11  ;;  %p860_p9 = scmp.lt.s32.totalorder %s1095_s5, %s1146_s3 }
 0x1ac   : > { %p861_p11 = scmp.lt.s32.totalorder %s859_s26, %s855_s11 }
 0x1ad   : > { %p857_p6 = pnand %p856_p7, %p1042_p13 }
 0x1ae   : > { %p862_p12 = por %p861_p11, %p860_p9 }
 0x1af   : > { %p858_p4 = pneg %p857_p6 }
 0x1b1   : > { %p863_p1 = pnand %p862_p12, %p858_p4 }
 0x1b3   : > { %866 = shalt.err (!%p863_p1)
}
 0x1b4   : > { %681 = dma.vmem_to_hbm [thread:$0]  (%p1042_p13), %s1097_s30, 192, %s1095_s5, %s494_s15  }
 0x1b5 PF: > { %s522_s24 = sand.u32 1, %s905_s12   ;;  %p1158_p8 = scmp.ne.s32.totalorder %s1151_s23, 0 }
 0x1b6   : > { %p1159_p10 = scmp.ge.s32.totalorder %s925_s17, 2  ;;  %s523_s27 = scalar_lea.sflag [#allocation4], %s522_s24 }
 0x1b8   : > { %p692_p0 = pnand %p1159_p10, %p1158_p8 }
 0x1ba   : > { %p693_p2 = pneg %p692_p0 }
 0x1bc   : > { %900 = dma.done.wait (%p693_p2), %s523_s27, 192  }
 0x1bd   : > { %902 = vsyncadd (%p693_p2), %s523_s27, 4294967104  ;;  %s20_s17 = sadd.s32 1, %s925_s17   ;;  %s1160_s12 = smov %s909_s13 }
 0x1be   : > { %p17_p3 = scmp.ge.s32.totalorder %s20_s17, 4   ;;  %s1161_s13 = smov %s913_s14 }
 0x1bf   : > { %s1162_s14 = smov %s1051_s19  ;;  %s1163_s15 = smov %s921_s16 }
 0x1c0   : > { %s1164_s16 = smov %s1166_s28  ;;  %19 = sbr.rel (!%p17_p3) target bundleno = 7 (0x7), region = 81 }
 0x1c5   :  { %528 = vsyncpa [#allocation3], 1 }
 0x1c6   :  { %530 = vsyncpa [#allocation3 + $0x1], 1 }
 0x1c7   :  { %531 = vsyncpa [#allocation6], 1 }
 0x1c8   :  { %532 = vsyncpa [#allocation4], 1 }
 0x1c9   :  { %534 = vsyncpa [#allocation4 + $0x1], 1 }

</bundles_post_ra>
